<compile_context>
chip_gen: v6e
topology: v6e:2x2x1
jax: 0.10.0
libtpu: 0.0.40
codegen_flags: <defaults>
</compile_context>

<pallas_src>
import functools

import jax
import jax.numpy as jnp
from jax import lax
from jax.experimental import pallas as pl
from jax.experimental.pallas import tpu as pltpu


def _erf(x):
    """Abramowitz & Stegun 7.1.26 erf approximation (max abs err ~1.5e-7).

    Used for exact-GELU semantics (nn.GELU() default) without relying on a
    native erf lowering; uses only exp/mul/add which map to EUP/VPU slots."""
    a1, a2, a3, a4, a5 = (0.254829592, -0.284496736, 1.421413741,
                          -1.453152027, 1.061405429)
    p = 0.3275911
    ax = jnp.abs(x)
    t = 1.0 / (1.0 + p * ax)
    poly = ((((a5 * t + a4) * t + a3) * t + a2) * t + a1) * t
    y = 1.0 - poly * jnp.exp(-ax * ax)
    return jnp.where(x < 0.0, -y, y)


def _layernorm(x, gamma, beta, eps):
    mu = jnp.mean(x, axis=-1, keepdims=True)
    xc = x - mu
    var = jnp.mean(xc * xc, axis=-1, keepdims=True)
    return xc * lax.rsqrt(var + eps) * gamma + beta


def transformer_block_kernel(x_ref,
                             ln1g_ref, ln1b_ref,
                             wqkv_ref, bqkv_ref,
                             wo_ref, bo_ref,
                             ln2g_ref, ln2b_ref,
                             w1_ref, b1_ref,
                             w2_ref, b2_ref,
                             o_ref, *, n_head, d_k, eps):
    """Grid = (B,). One full transformer block per batch element."""
    x = x_ref[0].astype(jnp.float32)                    # (N, D)
    D = x.shape[-1]

    # ---- LayerNorm 1 (pre-norm) ----
    res = _layernorm(x, ln1g_ref[...], ln1b_ref[...], eps)   # (N, D)

    # ---- fused, lane-dense QKV projection (Wq already folds 1/sqrt(d_k)) ----
    qkv = jnp.dot(res, wqkv_ref[...],
                  preferred_element_type=jnp.float32) + bqkv_ref[...]   # (N, 3D)
    q = qkv[:, 0 * D:1 * D]
    k = qkv[:, 1 * D:2 * D]
    v = qkv[:, 2 * D:3 * D]

    # ---- per-head scaled-dot-product attention (unrolled head loop) ----
    head_outs = []
    for h in range(n_head):                             # trace-time unrolled
        sl = slice(h * d_k, (h + 1) * d_k)
        qh, kh, vh = q[:, sl], k[:, sl], v[:, sl]       # (N, d_k) each
        # scores = qh @ kh^T without materializing a transpose of kh
        s = lax.dot_general(qh, kh, (((1,), (1,)), ((), ())),
                            preferred_element_type=jnp.float32)   # (N, N)
        m = jnp.max(s, axis=-1, keepdims=True)
        e = jnp.exp(s - m)
        l = jnp.sum(e, axis=-1, keepdims=True)          # (N, 1)
        pv = jnp.dot(e, vh, preferred_element_type=jnp.float32)   # (N, d_k)
        # normalize after the matmul: (N, d_k) multiplies instead of (N, N)
        head_outs.append(pv * pl.reciprocal(l, approx=False))
    concat = jnp.concatenate(head_outs, axis=-1)        # (N, D)

    # ---- output projection + residual 1 ----
    attn_out = jnp.dot(concat, wo_ref[...],
                       preferred_element_type=jnp.float32) + bo_ref[...]
    x1 = x + attn_out                                   # (N, D)

    # ---- LayerNorm 2 ----
    res2 = _layernorm(x1, ln2g_ref[...], ln2b_ref[...], eps)

    # ---- feed-forward (Linear -> exact GELU -> Linear) + residual 2 ----
    h1 = jnp.dot(res2, w1_ref[...],
                 preferred_element_type=jnp.float32) + b1_ref[...]      # (N, Dh)
    g = 0.5 * h1 * (1.0 + _erf(h1 * 0.7071067811865476))
    h2 = jnp.dot(g, w2_ref[...],
                 preferred_element_type=jnp.float32) + b2_ref[...]      # (N, D)

    o_ref[0] = (x1 + h2).astype(o_ref.dtype)


def enhanced_transformer_block(data, params, n_head, eps=1e-5):
    """data: (B, N, D) float32.  params holds PyTorch-convention Linear
    weights (out, in) / biases (out,) and LayerNorm gamma/beta (D,)."""
    B, N, D = data.shape
    d_k = D // n_head
    Dh = params["w1"].shape[0]
    scale = jnp.float32(1.0 / (d_k ** 0.5))

    # PyTorch Linear: y = x @ W.T + b  ->  store W.T (in, out) for the kernel.
    # Fold the attention scale into the Q projection.
    w_qkv = jnp.concatenate(
        [params["wq"].T * scale, params["wk"].T, params["wv"].T], axis=1)     # (D, 3D)
    b_qkv = jnp.concatenate(
        [params["bq"] * scale, params["bk"], params["bv"]]).reshape(1, 3 * D)  # (1, 3D)
    w_o = params["wo"].T                                # (D, D)
    b_o = params["bo"].reshape(1, D)
    ln1_g = params["ln1_g"].reshape(1, D)
    ln1_b = params["ln1_b"].reshape(1, D)
    ln2_g = params["ln2_g"].reshape(1, D)
    ln2_b = params["ln2_b"].reshape(1, D)
    w_1 = params["w1"].T                                # (D, Dh)
    b_1 = params["b1"].reshape(1, Dh)
    w_2 = params["w2"].T                                # (Dh, D)
    b_2 = params["b2"].reshape(1, D)

    kernel = functools.partial(transformer_block_kernel,
                               n_head=n_head, d_k=d_k, eps=eps)

    # Per-batch data blocks; all weights/biases are full-array blocks with a
    # constant index_map so they stay VMEM-resident across the whole grid.
    x_spec = pl.BlockSpec((1, N, D), lambda b: (b, 0, 0))
    resident = lambda shape: pl.BlockSpec(shape, lambda b: (0, 0))

    out = pl.pallas_call(
        kernel,
        out_shape=jax.ShapeDtypeStruct((B, N, D), data.dtype),
        grid_spec=pltpu.PrefetchScalarGridSpec(
            num_scalar_prefetch=0,
            grid=(B,),
            in_specs=[
                x_spec,
                resident((1, D)), resident((1, D)),          # LN1 gamma/beta
                resident((D, 3 * D)), resident((1, 3 * D)),  # fused QKV
                resident((D, D)), resident((1, D)),          # output proj
                resident((1, D)), resident((1, D)),          # LN2 gamma/beta
                resident((D, Dh)), resident((1, Dh)),        # FFN w1/b1
                resident((Dh, D)), resident((1, D)),         # FFN w2/b2
            ],
            out_specs=pl.BlockSpec((1, N, D), lambda b: (b, 0, 0)),
        ),
        compiler_params=pltpu.CompilerParams(
            dimension_semantics=("parallel",)),
    )(data, ln1_g, ln1_b, w_qkv, b_qkv, w_o, b_o,
      ln2_g, ln2_b, w_1, b_1, w_2, b_2)
    return out


def reference_block(data, params, n_head, eps=1e-5):
    """Pure-JAX reference matching the PyTorch forward (eval mode) exactly."""
    B, N, D = data.shape
    d_k = D // n_head

    def lin(x, w, b):
        return x @ w.T + b

    def ln(x, g, b):
        mu = x.mean(-1, keepdims=True)
        var = ((x - mu) ** 2).mean(-1, keepdims=True)
        return (x - mu) / jnp.sqrt(var + eps) * g + b

    def heads(x):
        return x.reshape(B, N, n_head, d_k).transpose(0, 2, 1, 3)

    res = ln(data, params["ln1_g"], params["ln1_b"])
    q = heads(lin(res, params["wq"], params["bq"]))
    k = heads(lin(res, params["wk"], params["bk"]))
    v = heads(lin(res, params["wv"], params["bv"]))
    scores = jnp.einsum("bhqd,bhkd->bhqk", q, k) / (d_k ** 0.5)
    attn = jax.nn.softmax(scores, axis=-1)
    o = jnp.einsum("bhqk,bhkd->bhqd", attn, v)
    o = o.transpose(0, 2, 1, 3).reshape(B, N, D)
    x1 = data + lin(o, params["wo"], params["bo"])

    res2 = ln(x1, params["ln2_g"], params["ln2_b"])
    h1 = lin(res2, params["w1"], params["b1"])
    g = 0.5 * h1 * (1.0 + jax.scipy.special.erf(h1 / jnp.sqrt(2.0)))  # exact GELU
    h2 = lin(g, params["w2"], params["b2"])
    return x1 + h2


if __name__ == "__main__":
    B, N, d_model, n_head, fc_ratio = 2, 8, 32, 4, 2
    d_hidden = d_model * fc_ratio

    key0 = jax.random.PRNGKey(0)
    keys = jax.random.split(key0, 24)
    scale = 1.0 / (d_model ** 0.5)

    data = jax.random.normal(keys[0], (B, N, d_model), dtype=jnp.float32)

    params = {
        "wq": jax.random.normal(keys[1], (d_model, d_model), jnp.float32) * scale,
        "bq": jax.random.normal(keys[2], (d_model,), jnp.float32) * scale,
        "wk": jax.random.normal(keys[3], (d_model, d_model), jnp.float32) * scale,
        "bk": jax.random.normal(keys[4], (d_model,), jnp.float32) * scale,
        "wv": jax.random.normal(keys[5], (d_model, d_model), jnp.float32) * scale,
        "bv": jax.random.normal(keys[6], (d_model,), jnp.float32) * scale,
        "wo": jax.random.normal(keys[7], (d_model, d_model), jnp.float32) * scale,
        "bo": jax.random.normal(keys[8], (d_model,), jnp.float32) * scale,
        "ln1_g": 1.0 + 0.1 * jax.random.normal(keys[9], (d_model,), jnp.float32),
        "ln1_b": 0.1 * jax.random.normal(keys[10], (d_model,), jnp.float32),
        "ln2_g": 1.0 + 0.1 * jax.random.normal(keys[11], (d_model,), jnp.float32),
        "ln2_b": 0.1 * jax.random.normal(keys[12], (d_model,), jnp.float32),
        "w1": jax.random.normal(keys[13], (d_hidden, d_model), jnp.float32) * scale,
        "b1": jax.random.normal(keys[14], (d_hidden,), jnp.float32) * scale,
        "w2": jax.random.normal(keys[15], (d_model, d_hidden), jnp.float32) * scale,
        "b2": jax.random.normal(keys[16], (d_model,), jnp.float32) * scale,
    }

    out = enhanced_transformer_block(data, params, n_head)
    out = jax.block_until_ready(out)

    ref = reference_block(data, params, n_head)
    assert out.shape == (B, N, d_model)
    err = jnp.max(jnp.abs(out - ref))
    assert jnp.allclose(out, ref, atol=1e-4, rtol=1e-4), f"max abs err = {err}"

    print("KERNEL_OK")
</pallas_src>

<mosaic_0001>
module attributes {stable_mosaic.version = 11 : i64} {
  func.func @transformer_block_kernel(%arg0: i32, %arg1: memref<1x8x32xf32, #tpu.memory_space<vmem>>, %arg2: memref<1x32xf32, #tpu.memory_space<vmem>>, %arg3: memref<1x32xf32, #tpu.memory_space<vmem>>, %arg4: memref<32x96xf32, #tpu.memory_space<vmem>>, %arg5: memref<1x96xf32, #tpu.memory_space<vmem>>, %arg6: memref<32x32xf32, #tpu.memory_space<vmem>>, %arg7: memref<1x32xf32, #tpu.memory_space<vmem>>, %arg8: memref<1x32xf32, #tpu.memory_space<vmem>>, %arg9: memref<1x32xf32, #tpu.memory_space<vmem>>, %arg10: memref<32x64xf32, #tpu.memory_space<vmem>>, %arg11: memref<1x64xf32, #tpu.memory_space<vmem>>, %arg12: memref<64x32xf32, #tpu.memory_space<vmem>>, %arg13: memref<1x32xf32, #tpu.memory_space<vmem>>, %arg14: memref<1x8x32xf32, #tpu.memory_space<vmem>>) attributes {dimension_semantics = [#tpu.dimension_semantics<parallel>], iteration_bounds = array<i64: 2>, scalar_prefetch = 0 : i64, scratch_operands = 0 : i64, tpu.core_type = #tpu.core_type<tc>, window_params = [{transform_indices = @transform_0, window_bounds = array<i64: 1, 8, 32>}, {pipeline_mode = #tpu.pipeline_mode<synchronous>, transform_indices = @transform_1, window_bounds = array<i64: 1, 32>}, {pipeline_mode = #tpu.pipeline_mode<synchronous>, transform_indices = @transform_2, window_bounds = array<i64: 1, 32>}, {pipeline_mode = #tpu.pipeline_mode<synchronous>, transform_indices = @transform_3, window_bounds = array<i64: 32, 96>}, {pipeline_mode = #tpu.pipeline_mode<synchronous>, transform_indices = @transform_4, window_bounds = array<i64: 1, 96>}, {pipeline_mode = #tpu.pipeline_mode<synchronous>, transform_indices = @transform_5, window_bounds = array<i64: 32, 32>}, {pipeline_mode = #tpu.pipeline_mode<synchronous>, transform_indices = @transform_6, window_bounds = array<i64: 1, 32>}, {pipeline_mode = #tpu.pipeline_mode<synchronous>, transform_indices = @transform_7, window_bounds = array<i64: 1, 32>}, {pipeline_mode = #tpu.pipeline_mode<synchronous>, transform_indices = @transform_8, window_bounds = array<i64: 1, 32>}, {pipeline_mode = #tpu.pipeline_mode<synchronous>, transform_indices = @transform_9, window_bounds = array<i64: 32, 64>}, {pipeline_mode = #tpu.pipeline_mode<synchronous>, transform_indices = @transform_10, window_bounds = array<i64: 1, 64>}, {pipeline_mode = #tpu.pipeline_mode<synchronous>, transform_indices = @transform_11, window_bounds = array<i64: 64, 32>}, {pipeline_mode = #tpu.pipeline_mode<synchronous>, transform_indices = @transform_12, window_bounds = array<i64: 1, 32>}, {transform_indices = @transform_13, window_bounds = array<i64: 1, 8, 32>}]} {
    %c0 = arith.constant 0 : index
    %c0_0 = arith.constant 0 : index
    %c0_1 = arith.constant 0 : index
    %0 = vector.load %arg1[%c0, %c0_0, %c0_1] : memref<1x8x32xf32, #tpu.memory_space<vmem>>, vector<1x8x32xf32>
    %1 = vector.shape_cast %0 : vector<1x8x32xf32> to vector<8x32xf32>
    %c0_2 = arith.constant 0 : index
    %c0_3 = arith.constant 0 : index
    %2 = vector.load %arg2[%c0_2, %c0_3] : memref<1x32xf32, #tpu.memory_space<vmem>>, vector<1x32xf32>
    %c0_4 = arith.constant 0 : index
    %c0_5 = arith.constant 0 : index
    %3 = vector.load %arg3[%c0_4, %c0_5] : memref<1x32xf32, #tpu.memory_space<vmem>>, vector<1x32xf32>
    %cst = arith.constant dense<0.000000e+00> : vector<8xf32>
    %4 = vector.multi_reduction <add>, %1, %cst [1] : vector<8x32xf32> to vector<8xf32>
    %5 = vector.shape_cast %4 : vector<8xf32> to vector<8x1xf32>
    %cst_6 = arith.constant 3.200000e+01 : f32
    %6 = vector.broadcast %cst_6 : f32 to vector<8x1xf32>
    %7 = arith.divf %5, %6 : vector<8x1xf32>
    %8 = vector.broadcast %7 : vector<8x1xf32> to vector<8x32xf32>
    %9 = arith.subf %1, %8 : vector<8x32xf32>
    %10 = arith.mulf %9, %9 : vector<8x32xf32>
    %cst_7 = arith.constant dense<0.000000e+00> : vector<8xf32>
    %11 = vector.multi_reduction <add>, %10, %cst_7 [1] : vector<8x32xf32> to vector<8xf32>
    %12 = vector.shape_cast %11 : vector<8xf32> to vector<8x1xf32>
    %cst_8 = arith.constant 3.200000e+01 : f32
    %13 = vector.broadcast %cst_8 : f32 to vector<8x1xf32>
    %14 = arith.divf %12, %13 : vector<8x1xf32>
    %cst_9 = arith.constant 9.99999974E-6 : f32
    %15 = vector.broadcast %cst_9 : f32 to vector<8x1xf32>
    %16 = arith.addf %14, %15 : vector<8x1xf32>
    %17 = math.rsqrt %16 : vector<8x1xf32>
    %18 = vector.broadcast %17 : vector<8x1xf32> to vector<8x32xf32>
    %19 = arith.mulf %9, %18 : vector<8x32xf32>
    %20 = vector.broadcast %2 : vector<1x32xf32> to vector<8x32xf32>
    %21 = arith.mulf %19, %20 : vector<8x32xf32>
    %22 = vector.broadcast %3 : vector<1x32xf32> to vector<8x32xf32>
    %23 = arith.addf %21, %22 : vector<8x32xf32>
    %c0_10 = arith.constant 0 : index
    %c0_11 = arith.constant 0 : index
    %24 = vector.load %arg4[%c0_10, %c0_11] : memref<32x96xf32, #tpu.memory_space<vmem>>, vector<32x96xf32>
    %cst_12 = arith.constant dense<0.000000e+00> : vector<8x96xf32>
    %25 = tpu.matmul %23, %24, %cst_12 {dimension_numbers = #tpu.dot_dimension_numbers<[1], [0], [0], [1], [0, 0, 1, 1], [], []>} : vector<8x32xf32>, vector<32x96xf32>, vector<8x96xf32> -> vector<8x96xf32>
    %c0_13 = arith.constant 0 : index
    %c0_14 = arith.constant 0 : index
    %26 = vector.load %arg5[%c0_13, %c0_14] : memref<1x96xf32, #tpu.memory_space<vmem>>, vector<1x96xf32>
    %27 = vector.broadcast %26 : vector<1x96xf32> to vector<8x96xf32>
    %28 = arith.addf %25, %27 : vector<8x96xf32>
    %29 = vector.extract_strided_slice %28 {offsets = [0, 0], sizes = [8, 32], strides = [1, 1]} : vector<8x96xf32> to vector<8x32xf32>
    %30 = vector.extract_strided_slice %28 {offsets = [0, 32], sizes = [8, 32], strides = [1, 1]} : vector<8x96xf32> to vector<8x32xf32>
    %31 = vector.extract_strided_slice %28 {offsets = [0, 64], sizes = [8, 32], strides = [1, 1]} : vector<8x96xf32> to vector<8x32xf32>
    %32 = vector.extract_strided_slice %29 {offsets = [0, 0], sizes = [8, 8], strides = [1, 1]} : vector<8x32xf32> to vector<8x8xf32>
    %33 = vector.extract_strided_slice %30 {offsets = [0, 0], sizes = [8, 8], strides = [1, 1]} : vector<8x32xf32> to vector<8x8xf32>
    %34 = vector.extract_strided_slice %31 {offsets = [0, 0], sizes = [8, 8], strides = [1, 1]} : vector<8x32xf32> to vector<8x8xf32>
    %cst_15 = arith.constant dense<0.000000e+00> : vector<8x8xf32>
    %35 = tpu.matmul %32, %33, %cst_15 {dimension_numbers = #tpu.dot_dimension_numbers<[1], [1], [0], [0], [0, 0, 1, 0], [], []>} : vector<8x8xf32>, vector<8x8xf32>, vector<8x8xf32> -> vector<8x8xf32>
    %cst_16 = arith.constant dense<0xFF800000> : vector<8xf32>
    %36 = vector.multi_reduction <maximumf>, %35, %cst_16 [1] : vector<8x8xf32> to vector<8xf32>
    %37 = vector.shape_cast %36 : vector<8xf32> to vector<8x1xf32>
    %38 = vector.broadcast %37 : vector<8x1xf32> to vector<8x8xf32>
    %39 = arith.subf %35, %38 : vector<8x8xf32>
    %40 = math.exp %39 : vector<8x8xf32>
    %cst_17 = arith.constant dense<0.000000e+00> : vector<8xf32>
    %41 = vector.multi_reduction <add>, %40, %cst_17 [1] : vector<8x8xf32> to vector<8xf32>
    %42 = vector.shape_cast %41 : vector<8xf32> to vector<8x1xf32>
    %cst_18 = arith.constant dense<0.000000e+00> : vector<8x8xf32>
    %43 = tpu.matmul %40, %34, %cst_18 {dimension_numbers = #tpu.dot_dimension_numbers<[1], [0], [0], [1], [0, 0, 1, 1], [], []>} : vector<8x8xf32>, vector<8x8xf32>, vector<8x8xf32> -> vector<8x8xf32>
    %44 = tpu.reciprocal %42 : vector<8x1xf32> -> vector<8x1xf32>
    %45 = vector.broadcast %44 : vector<8x1xf32> to vector<8x8xf32>
    %46 = arith.mulf %43, %45 : vector<8x8xf32>
    %47 = vector.extract_strided_slice %29 {offsets = [0, 8], sizes = [8, 8], strides = [1, 1]} : vector<8x32xf32> to vector<8x8xf32>
    %48 = vector.extract_strided_slice %30 {offsets = [0, 8], sizes = [8, 8], strides = [1, 1]} : vector<8x32xf32> to vector<8x8xf32>
    %49 = vector.extract_strided_slice %31 {offsets = [0, 8], sizes = [8, 8], strides = [1, 1]} : vector<8x32xf32> to vector<8x8xf32>
    %cst_19 = arith.constant dense<0.000000e+00> : vector<8x8xf32>
    %50 = tpu.matmul %47, %48, %cst_19 {dimension_numbers = #tpu.dot_dimension_numbers<[1], [1], [0], [0], [0, 0, 1, 0], [], []>} : vector<8x8xf32>, vector<8x8xf32>, vector<8x8xf32> -> vector<8x8xf32>
    %cst_20 = arith.constant dense<0xFF800000> : vector<8xf32>
    %51 = vector.multi_reduction <maximumf>, %50, %cst_20 [1] : vector<8x8xf32> to vector<8xf32>
    %52 = vector.shape_cast %51 : vector<8xf32> to vector<8x1xf32>
    %53 = vector.broadcast %52 : vector<8x1xf32> to vector<8x8xf32>
    %54 = arith.subf %50, %53 : vector<8x8xf32>
    %55 = math.exp %54 : vector<8x8xf32>
    %cst_21 = arith.constant dense<0.000000e+00> : vector<8xf32>
    %56 = vector.multi_reduction <add>, %55, %cst_21 [1] : vector<8x8xf32> to vector<8xf32>
    %57 = vector.shape_cast %56 : vector<8xf32> to vector<8x1xf32>
    %cst_22 = arith.constant dense<0.000000e+00> : vector<8x8xf32>
    %58 = tpu.matmul %55, %49, %cst_22 {dimension_numbers = #tpu.dot_dimension_numbers<[1], [0], [0], [1], [0, 0, 1, 1], [], []>} : vector<8x8xf32>, vector<8x8xf32>, vector<8x8xf32> -> vector<8x8xf32>
    %59 = tpu.reciprocal %57 : vector<8x1xf32> -> vector<8x1xf32>
    %60 = vector.broadcast %59 : vector<8x1xf32> to vector<8x8xf32>
    %61 = arith.mulf %58, %60 : vector<8x8xf32>
    %62 = vector.extract_strided_slice %29 {offsets = [0, 16], sizes = [8, 8], strides = [1, 1]} : vector<8x32xf32> to vector<8x8xf32>
    %63 = vector.extract_strided_slice %30 {offsets = [0, 16], sizes = [8, 8], strides = [1, 1]} : vector<8x32xf32> to vector<8x8xf32>
    %64 = vector.extract_strided_slice %31 {offsets = [0, 16], sizes = [8, 8], strides = [1, 1]} : vector<8x32xf32> to vector<8x8xf32>
    %cst_23 = arith.constant dense<0.000000e+00> : vector<8x8xf32>
    %65 = tpu.matmul %62, %63, %cst_23 {dimension_numbers = #tpu.dot_dimension_numbers<[1], [1], [0], [0], [0, 0, 1, 0], [], []>} : vector<8x8xf32>, vector<8x8xf32>, vector<8x8xf32> -> vector<8x8xf32>
    %cst_24 = arith.constant dense<0xFF800000> : vector<8xf32>
    %66 = vector.multi_reduction <maximumf>, %65, %cst_24 [1] : vector<8x8xf32> to vector<8xf32>
    %67 = vector.shape_cast %66 : vector<8xf32> to vector<8x1xf32>
    %68 = vector.broadcast %67 : vector<8x1xf32> to vector<8x8xf32>
    %69 = arith.subf %65, %68 : vector<8x8xf32>
    %70 = math.exp %69 : vector<8x8xf32>
    %cst_25 = arith.constant dense<0.000000e+00> : vector<8xf32>
    %71 = vector.multi_reduction <add>, %70, %cst_25 [1] : vector<8x8xf32> to vector<8xf32>
    %72 = vector.shape_cast %71 : vector<8xf32> to vector<8x1xf32>
    %cst_26 = arith.constant dense<0.000000e+00> : vector<8x8xf32>
    %73 = tpu.matmul %70, %64, %cst_26 {dimension_numbers = #tpu.dot_dimension_numbers<[1], [0], [0], [1], [0, 0, 1, 1], [], []>} : vector<8x8xf32>, vector<8x8xf32>, vector<8x8xf32> -> vector<8x8xf32>
    %74 = tpu.reciprocal %72 : vector<8x1xf32> -> vector<8x1xf32>
    %75 = vector.broadcast %74 : vector<8x1xf32> to vector<8x8xf32>
    %76 = arith.mulf %73, %75 : vector<8x8xf32>
    %77 = vector.extract_strided_slice %29 {offsets = [0, 24], sizes = [8, 8], strides = [1, 1]} : vector<8x32xf32> to vector<8x8xf32>
    %78 = vector.extract_strided_slice %30 {offsets = [0, 24], sizes = [8, 8], strides = [1, 1]} : vector<8x32xf32> to vector<8x8xf32>
    %79 = vector.extract_strided_slice %31 {offsets = [0, 24], sizes = [8, 8], strides = [1, 1]} : vector<8x32xf32> to vector<8x8xf32>
    %cst_27 = arith.constant dense<0.000000e+00> : vector<8x8xf32>
    %80 = tpu.matmul %77, %78, %cst_27 {dimension_numbers = #tpu.dot_dimension_numbers<[1], [1], [0], [0], [0, 0, 1, 0], [], []>} : vector<8x8xf32>, vector<8x8xf32>, vector<8x8xf32> -> vector<8x8xf32>
    %cst_28 = arith.constant dense<0xFF800000> : vector<8xf32>
    %81 = vector.multi_reduction <maximumf>, %80, %cst_28 [1] : vector<8x8xf32> to vector<8xf32>
    %82 = vector.shape_cast %81 : vector<8xf32> to vector<8x1xf32>
    %83 = vector.broadcast %82 : vector<8x1xf32> to vector<8x8xf32>
    %84 = arith.subf %80, %83 : vector<8x8xf32>
    %85 = math.exp %84 : vector<8x8xf32>
    %cst_29 = arith.constant dense<0.000000e+00> : vector<8xf32>
    %86 = vector.multi_reduction <add>, %85, %cst_29 [1] : vector<8x8xf32> to vector<8xf32>
    %87 = vector.shape_cast %86 : vector<8xf32> to vector<8x1xf32>
    %cst_30 = arith.constant dense<0.000000e+00> : vector<8x8xf32>
    %88 = tpu.matmul %85, %79, %cst_30 {dimension_numbers = #tpu.dot_dimension_numbers<[1], [0], [0], [1], [0, 0, 1, 1], [], []>} : vector<8x8xf32>, vector<8x8xf32>, vector<8x8xf32> -> vector<8x8xf32>
    %89 = tpu.reciprocal %87 : vector<8x1xf32> -> vector<8x1xf32>
    %90 = vector.broadcast %89 : vector<8x1xf32> to vector<8x8xf32>
    %91 = arith.mulf %88, %90 : vector<8x8xf32>
    %92 = tpu.concatenate %46, %61, %76, %91 in 1 : vector<8x8xf32>, vector<8x8xf32>, vector<8x8xf32>, vector<8x8xf32> -> vector<8x32xf32>
    %c0_31 = arith.constant 0 : index
    %c0_32 = arith.constant 0 : index
    %93 = vector.load %arg6[%c0_31, %c0_32] : memref<32x32xf32, #tpu.memory_space<vmem>>, vector<32x32xf32>
    %cst_33 = arith.constant dense<0.000000e+00> : vector<8x32xf32>
    %94 = tpu.matmul %92, %93, %cst_33 {dimension_numbers = #tpu.dot_dimension_numbers<[1], [0], [0], [1], [0, 0, 1, 1], [], []>} : vector<8x32xf32>, vector<32x32xf32>, vector<8x32xf32> -> vector<8x32xf32>
    %c0_34 = arith.constant 0 : index
    %c0_35 = arith.constant 0 : index
    %95 = vector.load %arg7[%c0_34, %c0_35] : memref<1x32xf32, #tpu.memory_space<vmem>>, vector<1x32xf32>
    %96 = vector.broadcast %95 : vector<1x32xf32> to vector<8x32xf32>
    %97 = arith.addf %94, %96 : vector<8x32xf32>
    %98 = arith.addf %1, %97 : vector<8x32xf32>
    %c0_36 = arith.constant 0 : index
    %c0_37 = arith.constant 0 : index
    %99 = vector.load %arg8[%c0_36, %c0_37] : memref<1x32xf32, #tpu.memory_space<vmem>>, vector<1x32xf32>
    %c0_38 = arith.constant 0 : index
    %c0_39 = arith.constant 0 : index
    %100 = vector.load %arg9[%c0_38, %c0_39] : memref<1x32xf32, #tpu.memory_space<vmem>>, vector<1x32xf32>
    %cst_40 = arith.constant dense<0.000000e+00> : vector<8xf32>
    %101 = vector.multi_reduction <add>, %98, %cst_40 [1] : vector<8x32xf32> to vector<8xf32>
    %102 = vector.shape_cast %101 : vector<8xf32> to vector<8x1xf32>
    %cst_41 = arith.constant 3.200000e+01 : f32
    %103 = vector.broadcast %cst_41 : f32 to vector<8x1xf32>
    %104 = arith.divf %102, %103 : vector<8x1xf32>
    %105 = vector.broadcast %104 : vector<8x1xf32> to vector<8x32xf32>
    %106 = arith.subf %98, %105 : vector<8x32xf32>
    %107 = arith.mulf %106, %106 : vector<8x32xf32>
    %cst_42 = arith.constant dense<0.000000e+00> : vector<8xf32>
    %108 = vector.multi_reduction <add>, %107, %cst_42 [1] : vector<8x32xf32> to vector<8xf32>
    %109 = vector.shape_cast %108 : vector<8xf32> to vector<8x1xf32>
    %cst_43 = arith.constant 3.200000e+01 : f32
    %110 = vector.broadcast %cst_43 : f32 to vector<8x1xf32>
    %111 = arith.divf %109, %110 : vector<8x1xf32>
    %cst_44 = arith.constant 9.99999974E-6 : f32
    %112 = vector.broadcast %cst_44 : f32 to vector<8x1xf32>
    %113 = arith.addf %111, %112 : vector<8x1xf32>
    %114 = math.rsqrt %113 : vector<8x1xf32>
    %115 = vector.broadcast %114 : vector<8x1xf32> to vector<8x32xf32>
    %116 = arith.mulf %106, %115 : vector<8x32xf32>
    %117 = vector.broadcast %99 : vector<1x32xf32> to vector<8x32xf32>
    %118 = arith.mulf %116, %117 : vector<8x32xf32>
    %119 = vector.broadcast %100 : vector<1x32xf32> to vector<8x32xf32>
    %120 = arith.addf %118, %119 : vector<8x32xf32>
    %c0_45 = arith.constant 0 : index
    %c0_46 = arith.constant 0 : index
    %121 = vector.load %arg10[%c0_45, %c0_46] : memref<32x64xf32, #tpu.memory_space<vmem>>, vector<32x64xf32>
    %cst_47 = arith.constant dense<0.000000e+00> : vector<8x64xf32>
    %122 = tpu.matmul %120, %121, %cst_47 {dimension_numbers = #tpu.dot_dimension_numbers<[1], [0], [0], [1], [0, 0, 1, 1], [], []>} : vector<8x32xf32>, vector<32x64xf32>, vector<8x64xf32> -> vector<8x64xf32>
    %c0_48 = arith.constant 0 : index
    %c0_49 = arith.constant 0 : index
    %123 = vector.load %arg11[%c0_48, %c0_49] : memref<1x64xf32, #tpu.memory_space<vmem>>, vector<1x64xf32>
    %124 = vector.broadcast %123 : vector<1x64xf32> to vector<8x64xf32>
    %125 = arith.addf %122, %124 : vector<8x64xf32>
    %cst_50 = arith.constant 5.000000e-01 : f32
    %126 = vector.broadcast %cst_50 : f32 to vector<8x64xf32>
    %127 = arith.mulf %126, %125 : vector<8x64xf32>
    %cst_51 = arith.constant 0.707106769 : f32
    %128 = vector.broadcast %cst_51 : f32 to vector<8x64xf32>
    %129 = arith.mulf %125, %128 : vector<8x64xf32>
    %130 = math.absf %129 : vector<8x64xf32>
    %cst_52 = arith.constant 0.327591091 : f32
    %131 = vector.broadcast %cst_52 : f32 to vector<8x64xf32>
    %132 = arith.mulf %131, %130 : vector<8x64xf32>
    %cst_53 = arith.constant 1.000000e+00 : f32
    %133 = vector.broadcast %cst_53 : f32 to vector<8x64xf32>
    %134 = arith.addf %133, %132 : vector<8x64xf32>
    %cst_54 = arith.constant 1.000000e+00 : f32
    %135 = vector.broadcast %cst_54 : f32 to vector<8x64xf32>
    %136 = arith.divf %135, %134 : vector<8x64xf32>
    %cst_55 = arith.constant 1.06140542 : f32
    %137 = vector.broadcast %cst_55 : f32 to vector<8x64xf32>
    %138 = arith.mulf %137, %136 : vector<8x64xf32>
    %cst_56 = arith.constant -1.45315206 : f32
    %139 = vector.broadcast %cst_56 : f32 to vector<8x64xf32>
    %140 = arith.addf %138, %139 : vector<8x64xf32>
    %141 = arith.mulf %140, %136 : vector<8x64xf32>
    %cst_57 = arith.constant 1.42141378 : f32
    %142 = vector.broadcast %cst_57 : f32 to vector<8x64xf32>
    %143 = arith.addf %141, %142 : vector<8x64xf32>
    %144 = arith.mulf %143, %136 : vector<8x64xf32>
    %cst_58 = arith.constant -0.284496725 : f32
    %145 = vector.broadcast %cst_58 : f32 to vector<8x64xf32>
    %146 = arith.addf %144, %145 : vector<8x64xf32>
    %147 = arith.mulf %146, %136 : vector<8x64xf32>
    %cst_59 = arith.constant 0.254829586 : f32
    %148 = vector.broadcast %cst_59 : f32 to vector<8x64xf32>
    %149 = arith.addf %147, %148 : vector<8x64xf32>
    %150 = arith.mulf %149, %136 : vector<8x64xf32>
    %cst_60 = arith.constant 0.000000e+00 : f32
    %151 = vector.broadcast %cst_60 : f32 to vector<8x64xf32>
    %152 = arith.subf %151, %130 : vector<8x64xf32>
    %153 = arith.mulf %152, %130 : vector<8x64xf32>
    %154 = math.exp %153 : vector<8x64xf32>
    %155 = arith.mulf %150, %154 : vector<8x64xf32>
    %cst_61 = arith.constant 1.000000e+00 : f32
    %156 = vector.broadcast %cst_61 : f32 to vector<8x64xf32>
    %157 = arith.subf %156, %155 : vector<8x64xf32>
    %cst_62 = arith.constant 0.000000e+00 : f32
    %158 = vector.broadcast %cst_62 : f32 to vector<8x64xf32>
    %159 = arith.cmpf olt, %129, %158 : vector<8x64xf32>
    %cst_63 = arith.constant 0.000000e+00 : f32
    %160 = vector.broadcast %cst_63 : f32 to vector<8x64xf32>
    %161 = arith.subf %160, %157 : vector<8x64xf32>
    %162 = arith.select %159, %161, %157 : vector<8x64xi1>, vector<8x64xf32>
    %cst_64 = arith.constant 1.000000e+00 : f32
    %163 = vector.broadcast %cst_64 : f32 to vector<8x64xf32>
    %164 = arith.addf %163, %162 : vector<8x64xf32>
    %165 = arith.mulf %127, %164 : vector<8x64xf32>
    %c0_65 = arith.constant 0 : index
    %c0_66 = arith.constant 0 : index
    %166 = vector.load %arg12[%c0_65, %c0_66] : memref<64x32xf32, #tpu.memory_space<vmem>>, vector<64x32xf32>
    %cst_67 = arith.constant dense<0.000000e+00> : vector<8x32xf32>
    %167 = tpu.matmul %165, %166, %cst_67 {dimension_numbers = #tpu.dot_dimension_numbers<[1], [0], [0], [1], [0, 0, 1, 1], [], []>} : vector<8x64xf32>, vector<64x32xf32>, vector<8x32xf32> -> vector<8x32xf32>
    %c0_68 = arith.constant 0 : index
    %c0_69 = arith.constant 0 : index
    %168 = vector.load %arg13[%c0_68, %c0_69] : memref<1x32xf32, #tpu.memory_space<vmem>>, vector<1x32xf32>
    %169 = vector.broadcast %168 : vector<1x32xf32> to vector<8x32xf32>
    %170 = arith.addf %167, %169 : vector<8x32xf32>
    %171 = arith.addf %98, %170 : vector<8x32xf32>
    %c0_70 = arith.constant 0 : index
    %c0_71 = arith.constant 0 : index
    %c0_72 = arith.constant 0 : index
    %172 = vector.load %arg14[%c0_70, %c0_71, %c0_72] : memref<1x8x32xf32, #tpu.memory_space<vmem>>, vector<1x8x32xf32>
    %173 = vector.shape_cast %172 : vector<1x8x32xf32> to vector<8x32xf32>
    %174 = vector.shape_cast %171 : vector<8x32xf32> to vector<1x8x32xf32>
    tpu.vector_store %arg14[%c0_70, %c0_71, %c0_72], %174 {strides = array<i32>} : memref<1x8x32xf32, #tpu.memory_space<vmem>>, vector<1x8x32xf32>,
    return
  }
  func.func @transform_0(%arg0: i32) -> (i32, i32, i32) {
    %c0_i32 = arith.constant 0 : i32
    %c0_i32_0 = arith.constant 0 : i32
    %c0_i32_1 = arith.constant 0 : i32
    return %arg0, %c0_i32, %c0_i32_0 : i32, i32, i32
  }
  func.func @transform_1(%arg0: i32) -> (i32, i32) {
    %c0_i32 = arith.constant 0 : i32
    %c0_i32_0 = arith.constant 0 : i32
    %c0_i32_1 = arith.constant 0 : i32
    return %c0_i32, %c0_i32_0 : i32, i32
  }
  func.func @transform_2(%arg0: i32) -> (i32, i32) {
    %c0_i32 = arith.constant 0 : i32
    %c0_i32_0 = arith.constant 0 : i32
    %c0_i32_1 = arith.constant 0 : i32
    return %c0_i32, %c0_i32_0 : i32, i32
  }
  func.func @transform_3(%arg0: i32) -> (i32, i32) {
    %c0_i32 = arith.constant 0 : i32
    %c0_i32_0 = arith.constant 0 : i32
    %c0_i32_1 = arith.constant 0 : i32
    return %c0_i32, %c0_i32_0 : i32, i32
  }
  func.func @transform_4(%arg0: i32) -> (i32, i32) {
    %c0_i32 = arith.constant 0 : i32
    %c0_i32_0 = arith.constant 0 : i32
    %c0_i32_1 = arith.constant 0 : i32
    return %c0_i32, %c0_i32_0 : i32, i32
  }
  func.func @transform_5(%arg0: i32) -> (i32, i32) {
    %c0_i32 = arith.constant 0 : i32
    %c0_i32_0 = arith.constant 0 : i32
    %c0_i32_1 = arith.constant 0 : i32
    return %c0_i32, %c0_i32_0 : i32, i32
  }
  func.func @transform_6(%arg0: i32) -> (i32, i32) {
    %c0_i32 = arith.constant 0 : i32
    %c0_i32_0 = arith.constant 0 : i32
    %c0_i32_1 = arith.constant 0 : i32
    return %c0_i32, %c0_i32_0 : i32, i32
  }
  func.func @transform_7(%arg0: i32) -> (i32, i32) {
    %c0_i32 = arith.constant 0 : i32
    %c0_i32_0 = arith.constant 0 : i32
    %c0_i32_1 = arith.constant 0 : i32
    return %c0_i32, %c0_i32_0 : i32, i32
  }
  func.func @transform_8(%arg0: i32) -> (i32, i32) {
    %c0_i32 = arith.constant 0 : i32
    %c0_i32_0 = arith.constant 0 : i32
    %c0_i32_1 = arith.constant 0 : i32
    return %c0_i32, %c0_i32_0 : i32, i32
  }
  func.func @transform_9(%arg0: i32) -> (i32, i32) {
    %c0_i32 = arith.constant 0 : i32
    %c0_i32_0 = arith.constant 0 : i32
    %c0_i32_1 = arith.constant 0 : i32
    return %c0_i32, %c0_i32_0 : i32, i32
  }
  func.func @transform_10(%arg0: i32) -> (i32, i32) {
    %c0_i32 = arith.constant 0 : i32
    %c0_i32_0 = arith.constant 0 : i32
    %c0_i32_1 = arith.constant 0 : i32
    return %c0_i32, %c0_i32_0 : i32, i32
  }
  func.func @transform_11(%arg0: i32) -> (i32, i32) {
    %c0_i32 = arith.constant 0 : i32
    %c0_i32_0 = arith.constant 0 : i32
    %c0_i32_1 = arith.constant 0 : i32
    return %c0_i32, %c0_i32_0 : i32, i32
  }
  func.func @transform_12(%arg0: i32) -> (i32, i32) {
    %c0_i32 = arith.constant 0 : i32
    %c0_i32_0 = arith.constant 0 : i32
    %c0_i32_1 = arith.constant 0 : i32
    return %c0_i32, %c0_i32_0 : i32, i32
  }
  func.func @transform_13(%arg0: i32) -> (i32, i32, i32) {
    %c0_i32 = arith.constant 0 : i32
    %c0_i32_0 = arith.constant 0 : i32
    %c0_i32_1 = arith.constant 0 : i32
    return %arg0, %c0_i32, %c0_i32_0 : i32, i32, i32
  }
}

</mosaic_0001>

<bundles_post_ra>
// kernel: tpu_custom_call.1
= control target key start
LH: loop header
LB: loop body
LE: loop exit
PB: predicated region body
PF: predicated region fallthrough
CT: control target
= control target key end

     0   :  { %s2419_s0 = inlined_call_operand.hbm [shape: f32[2,8,32], index: 0, kind: input, shape index: {}]   ;;  %s2420_s1 = inlined_call_operand.vmem [shape: f32[1,32], index: 1, kind: input, shape index: {}]   ;;  %s2421_s2 = inlined_call_operand.vmem [shape: f32[1,32], index: 2, kind: input, shape index: {}]   ;;  %s2422_s3 = inlined_call_operand.vmem [shape: f32[32,96], index: 3, kind: input, shape index: {}]   ;;  %s2423_s4 = inlined_call_operand.vmem [shape: f32[1,96], index: 4, kind: input, shape index: {}]   ;;  %s2424_s5 = inlined_call_operand.vmem [shape: f32[32,32], index: 5, kind: input, shape index: {}]   ;;  %s2425_s6 = inlined_call_operand.vmem [shape: f32[1,32], index: 6, kind: input, shape index: {}]   ;;  %s2426_s7 = inlined_call_operand.vmem [shape: f32[1,32], index: 7, kind: input, shape index: {}]   ;;  %s2427_s8 = inlined_call_operand.vmem [shape: f32[1,32], index: 8, kind: input, shape index: {}]   ;;  %s2428_s9 = inlined_call_operand.vmem [shape: f32[32,64], index: 9, kind: input, shape index: {}]   ;;  %s2429_s10 = inlined_call_operand.vmem [shape: f32[1,64], index: 10, kind: input, shape index: {}]   ;;  %s2430_s11 = inlined_call_operand.vmem [shape: f32[64,32], index: 11, kind: input, shape index: {}]   ;;  %s2431_s12 = inlined_call_operand.vmem [shape: f32[1,32], index: 12, kind: input, shape index: {}]   ;;  %s2432_s13 = inlined_call_operand.hbm [shape: f32[2,8,32], index: 13, kind: output, shape index: {}]  }
   0x1   :  { %2441 = sst [smem:[#allocation13_spill]] %s2432_s13 }
   0x2   :  { %18 = vsyncpa [#allocation3], 0 }
   0x3   :  { %20 = vsyncpa [#allocation3 + $0x1], 0 }
   0x4   :  { %21 = vsyncpa [#allocation4], 0 }
   0x5   :  { %23 = vsyncpa [#allocation4 + $0x1], 0  ;;  %s2085_s25 = smov 0   ;;  %s2087_s26 = smov 0  }
   0x6   :  { %s2089_s27 = smov 0   ;;  %s2091_s28 = smov 0  }
   0x7 LB: > { %2442 = sst [smem:[#allocation8_spill]] %s1983_s25  ;;  %s2106_s29 = sadd.s32 4294967295, %s1995_s28   ;;  %s1995_s28 = sphi %s2091_s28, %s2461_s28   ;;  %s1991_s27 = sphi %s2089_s27, %s2463_s27   ;;  %s1987_s26 = sphi %s2087_s26, %s2465_s26   ;;  %s1983_s25 = sphi %s2085_s25, %s2464_s25  }
   0x8   : > { %2443 = sst [smem:[#allocation9_spill]] %s1991_s27  ;;  %s1649_s30 = sadd.s32 4294967294, %s1995_s28  }
   0x9   : > { %s2110_s14 = sadd.s32 1, %s1995_s28   ;;  %s36_s15 = sadd.s32 1, %s1991_s27 }
   0xa   : > { %2444 = sst [smem:[#allocation10_spill]] %s2110_s14  ;;  %s33_s16 = ssub.s32 %s1995_s28, %s2110_s14 }
   0xb   : > { %p43_p0 = scmp.ne.s32.totalorder %s1991_s27, %s1987_s26  ;;  %p34_p1 = scmp.eq.s32.totalorder %s33_s16, 0 }
   0xc   : > { %p44_p2 = scmp.eq.s32.totalorder %s1995_s28, 0  ;;  %p49_p3 = scmp.ne.s32.totalorder %s1987_s26, %s1983_s25 }
   0xd   : > { %p50_p4 = scmp.eq.s32.totalorder %s2106_s29, 0  ;;  %p325_p7 = scmp.eq.s32.totalorder %s2106_s29, 1 }
   0xe   : > { %s2122_s17 = scalar_select %p34_p1, %s1991_s27, %s36_s15  }
   0xf   : > { %p2124_p5 = por %p44_p2, %p43_p0  ;;  %p2128_p6 = por %p50_p4, %p49_p3 }
  0x10   : > { %2445 = sst [smem:[#allocation11_spill]] %s2122_s17  ;;  %p331_p8 = scmp.eq.s32.totalorder %s1649_s30, 1 }
  0x11   : > { %s2447_s19 = scalar_select %p2128_p6, 1, 0 }
  0x12   : > { %p1829_p10 = scmp.lt.s32.totalorder %s1995_s28, 2  ;;  %p2135_p11 = por %p325_p7, %p43_p0 }
  0x13   : > { %p2139_p12 = por %p331_p8, %p49_p3  ;;  %s387_s22 = sand.u32 1, %s1991_s27  }
  0x14   : > { %s2448_s20 = scalar_select %p2135_p11, 1, 0 }
  0x15   : > { %s2449_s21 = scalar_select %p2139_p12, 1, 0 }
  0x16   : > { %s1653_s23 = sshll.u32 %s1995_s28, 7  ;;  %s1652_s24 = sshll.u32 %s387_s22, 3 }
  0x17   : > { %2450 = sst [smem:[#allocation12_spill]] %s2449_s21  ;;  %s2148_s17 = scalar_lea.hbm %s2419_s0, %s1653_s23 }
  0x18   : > { %s391_s30 = scalar_lea.vmem [#allocation2], %s1652_s24  ;;  %p2152_p13 = pnand %p1829_p10, %p2124_p5 }
  0x19   : > { %s398_s14 = sshll.u32 %s391_s30, 4  ;;  %s388_s27 = scalar_lea.sflag [#allocation3], %s387_s22  ;;  %s2156_s14 = int_to_ptr.vmem [resolvable:$true] %s398_s14 }
  0x1a   : > { %s1903_s21 = scalar_lea.hbm %s2148_s17, 128  ;;  %p1905_p3 = pneg %p2152_p13 }
  0x1b   : > { %p1904_p2 = scmp.ne.s32.totalorder %s2148_s17, %s1903_s21  ;;  %s1908_s18 = scalar_lea.hbm %s2419_s0, 256 }
  0x1c   : > { %p1909_p5 = scmp.lt.s32.totalorder %s2148_s17, %s2419_s0  ;;  %p1910_p8 = scmp.lt.s32.totalorder %s1908_s18, %s1903_s21 }
  0x1d   : > { %p1906_p4 = pnand %p1905_p3, %p1904_p2 }
  0x1e   : > { %p1911_p10 = por %p1910_p8, %p1909_p5 }
  0x1f   : > { %p1907_p7 = pneg %p1906_p4 }
  0x21   : > { %p1912_p9 = pnand %p1911_p10, %p1907_p7 }
  0x23   : > { %1915 = shalt.err (!%p1912_p9)
}
  0x24   : > { %s1916_s22 = scalar_lea.vmem %s2156_s14, 128  ;;  %s1997_s30 = smov [#allocation2]  }
  0x25   : > { %p1917_p0 = scmp.ne.s32.totalorder %s2156_s14, %s1916_s22  ;;  %s1921_s13 = sshll.u32 %s1997_s30, 4  ;;  %s1922_s13 = int_to_ptr.vmem [resolvable:$false] %s1921_s13 }
  0x26   : > { %s1923_s23 = scalar_lea.vmem %s1922_s13, 256  ;;  %p1924_p4 = scmp.lt.s32.totalorder %s2156_s14, %s1922_s13 }
  0x27   : > { %p1919_p1 = pnand %p1917_p0, %p1905_p3  ;;  %p1925_p12 = scmp.lt.s32.totalorder %s1923_s23, %s1916_s22 }
  0x29   : > { %p1920_p2 = pneg %p1919_p1  ;;  %p1926_p11 = por %p1925_p12, %p1924_p4 }
  0x2b   : > { %p1927_p6 = pnand %p1926_p11, %p1920_p2 }
  0x2d   : > { %1930 = shalt.err (!%p1927_p6)
}
  0x2e   : > { %1824 = dma.hbm_to_vmem [thread:$0]  (!%p2152_p13), %s2148_s17, 128, %s2156_s14, %s388_s27  }
  0x2f   : > { %p2452_p9 = scmp.lt.s32.totalorder %s1995_s28, 3  ;;  %p2453_p7 = scmp.ge.s32.totalorder %s1995_s28, 1 }
  0x31   : > { %p404_p0 = pnand %p2453_p7, %p2452_p9 }
  0x32   : > { %s2183_s21 = sand.u32 (!%p404_p0), 1, %s1987_s26   ;;  %p2454_p6 = scmp.ne.s32.totalorder (!%p404_p0), %s2447_s19, 0 }
  0x33   : > { %407 = sbr.rel (%p404_p0) target bundleno = 2318 (0x90e), region = 72  ;;  %s1655_s13 = sshll.u32 (!%p404_p0), %s2183_s21, 3 }
  0x34   : > { %s410_s24 = scalar_lea.sflag (!%p404_p0), [#allocation3], %s2183_s21  ;;  %s413_s25 = scalar_lea.vmem (!%p404_p0), [#allocation2], %s1655_s13 }
  0x38   : > { %1974 = dma.done.wait (%p2454_p6), %s410_s24, 128  }
  0x39   : > { %1976 = vsyncadd (%p2454_p6), %s410_s24, 4294967168  ;;  %vm459_vm0 = vcmask 261120   ;;  %v2193_v0 = vld [vmem:[%s413_s25] sm:$0xff]  ;;  %v491_v7 = vld [vmem:[%s2422_s3 + $0x18] sm:$0xff]  ;;  %v1998_v8 = vmov 0.0   ;;  %vm1999_vm1 = vmmov 0  }
  0x3a   : > { %v460_v1 = vsel %vm459_vm0, %v2193_v0, 0.0  ;;  %1725 = vmatprep.subr.mxu1 %v1998_v8  ;;  %v490_v9 = vld [vmem:[%s2422_s3 + $0x10] sm:$0xff]  ;;  %1733 = vmatprep.mubr.msk.f32.mxu1 %vm1999_vm1, %v1998_v8  ;;  %v489_v10 = vld [vmem:[%s2422_s3 + $0x8] sm:$0xff]  ;;  %v488_v11 = vld [vmem:[%s2422_s3] sm:$0xff]  ;;  %s2000_s17 = smov 120   ;;  %s2001_s19 = smov 96  }
  0x3b   : > { %461 = vadd.xlane.f32.xlu0 %v460_v1  ;;  %1726 = vmatpush3.msra.mxu1 %v491_v7  ;;  %v1657_v16 = vld [vmem:[%s2420_s1] ss:$0 sm:$0xff]  ;;  %s2002_s18 = smov 88   ;;  %s2003_s15 = smov 80   ;;  %vm575_vm2 = vcmask 64512   ;;  %v1252_v7 = vld [vmem:[%s2424_s5 + $0x18] sm:$0xff] }
  0x3c   : > { %1746 = vmatprep.subr.mxu0 %v1998_v8  ;;  %1727 = vmatprep.subr.mxu1 %v1998_v8  ;;  %v1658_v18 = vld [vmem:[%s2421_s2] ss:$0 sm:$0xff]  ;;  %s2004_s16 = smov 112   ;;  %s2005_s22 = smov 72   ;;  %vm1245_vm3 = vcmask 130048   ;;  %vm1247_vm4 = vcmask 195584  }
  0x3d   : > { %1748 = vmatprep.mubr.msk.f32.mxu0 %vm1999_vm1, %v1998_v8  ;;  %1728 = vmatpush3.msra.mxu1 %v490_v9  ;;  %v1659_v21 = vld [vmem:[%s2423_s4] ss:$0 sm:$0xff]  ;;  %s2006_s30 = smov 104   ;;  %s2007_s23 = smov 64   ;;  %v1251_v9 = vld [vmem:[%s2424_s5 + $0x10] sm:$0xff]  ;;  %vm1489_vm6 = vcmask 523264  }
  0x3e   : > { %1729 = vmatprep.subr.mxu1 %v1998_v8  ;;  %s2008_s24 = smov 48   ;;  %s2009_s25 = smov 40  }
  0x3f   : > { %1730 = vmatpush3.msra.mxu1 %v489_v10  ;;  %s2010_s27 = smov 56   ;;  %p2456_p12 = scmp.ne.s32.totalorder %s2448_s20, 0 }
  0x40   : > { %1731 = vmatprep.subr.mxu1 %v1998_v8 }
  0x41   : > { %1732 = vmatpush3.msra.mxu1 %v488_v11 }
  0x42   : > { %1736 = vmatprep.subr.mxu1 %v1998_v8 }
  0xc4   : > { %v462_v2 = vpop.xlane.xlu0 %461 }
  0xc5   : > { %v464_v3 = vmul.f32 0.03125, %v462_v2 }
  0xc7   : > { %v465_v4 = vsub.f32 %v2193_v0, %v464_v3 }
  0xc9   : > { %v466_v5 = vmul.f32 %v465_v4, %v465_v4 }
  0xcb   : > { %v467_v6 = vsel %vm459_vm0, %v466_v5, 0.0 }
  0xcc   : > { %468 = vadd.xlane.f32.xlu0 %v467_v6 }
 0x155   : > { %v469_v12 = vpop.xlane.xlu0 %468 }
 0x156   : > { %v470_v13 = vmul.f32 0.03125, %v469_v12  ;;  %v1250_v12 = vld [vmem:[%s2424_s5 + $0x8] sm:$0xff] }
 0x158   : > { %v471_v14 = vadd.f32 1e-05, %v470_v13 }
 0x15a   : > { %1879 = vrsqrt.f32 %v471_v14 }
 0x167   : > { %v1880_v15 = vpop.eup %1879 }
 0x168   : > { %v473_v17 = vmul.f32 %v1880_v15, %v465_v4 }
 0x16a   : > { %v480_v19 = vmul.f32 %v1657_v16, %v473_v17 }
 0x16c   : > { %v487_v20 = vadd.f32 %v1658_v18, %v480_v19  ;;  %v1249_v18 = vld [vmem:[%s2424_s5] sm:$0xff] }
 0x16e   : > { %1734 = vmatmul.mubr.msk.f32.vlgmr.msra.gmra.mxu1 %vm459_vm0, %v487_v20 }
 0x16f   : > { %1738 = vmatprep.mubr.msk.f32.mxu1 %vm1999_vm1, %v1998_v8 }
 0x22e   : > { %v568_v22 = vpop.f32.mrf.mxu1 }
 0x22f   : > { %v2233_v23 = vadd.f32 %v1659_v21, %v568_v22 }
 0x230   : > { %v1735_v24 = vpop.f32.mrf.mxu1 }
 0x231   : > { %737 = vrot.lane.b32.xlu0 %v2233_v23, %s2000_s17  ;;  %573 = vrot.lane.b32.xlu1 %v2233_v23, %s2001_s19  ;;  %s2455_s19 = sld [smem:[#allocation13_spill]] }
 0x235   : > { %739 = vrot.lane.b32.xlu1 %v2233_v23, %s2002_s18 }
 0x239   : > { %904 = vrot.lane.b32.xlu1 %v2233_v23, %s2003_s15  ;;  %s1566_s15 = scalar_lea.sflag [#allocation4], %s2183_s21 }
 0x23d   : > { %902 = vrot.lane.b32.xlu1 %v2233_v23, %s2004_s16 }
 0x241   : > { %1069 = vrot.lane.b32.xlu1 %v2233_v23, %s2005_s22  ;;  %s2011_s22 = smov 8  }
 0x245   : > { %1067 = vrot.lane.b32.xlu1 %v2233_v23, %s2006_s30 }
 0x249   : > { %659 = vrot.lane.b32.xlu1 %v2233_v23, %s2007_s23 }
 0x2a3   : > { %v574_v25 = vpop.permute.xlu1 %573  ;;  %v738_v27 = vpop.permute.xlu0 %737 }
 0x2a4   : > { %1737 = vmatpush3.xpose.msk.msra.mxu1 %vm575_vm2, %v574_v25 }
 0x2a5   : > { %1741 = vmatprep.subr.mxu1 %v1998_v8 }
 0x2a7   : > { %1739 = vmatmul.mubr.msk.f32.vlgmr.msra.gmra.mxu1 %vm575_vm2, %v2233_v23  ;;  %v740_v26 = vpop.permute.xlu1 %739 }
 0x2a8   : > { %1747 = vmatpush3.xpose.msk.msra.mxu0 %vm575_vm2, %v740_v26  ;;  %1743 = vmatprep.mubr.msk.f32.mxu1 %vm1999_vm1, %v1998_v8 }
 0x2a9   : > { %1756 = vmatprep.subr.mxu0 %v1998_v8 }
 0x2ab   : > { %1749 = vmatmul.mubr.msk.f32.vlgmr.msra.gmra.mxu0 %vm575_vm2, %v738_v27  ;;  %v905_v28 = vpop.permute.xlu1 %904 }
 0x2ac   : > { %1757 = vmatpush3.xpose.msk.msra.mxu0 %vm575_vm2, %v905_v28  ;;  %1758 = vmatprep.mubr.msk.f32.mxu0 %vm1999_vm1, %v1998_v8 }
 0x2ad   : > { %1766 = vmatprep.subr.mxu0 %v1998_v8 }
 0x2af   : > { %v903_v29 = vpop.permute.xlu1 %902 }
 0x2b0   : > { %1759 = vmatmul.mubr.msk.f32.vlgmr.msra.gmra.mxu0 %vm575_vm2, %v903_v29 }
 0x2b1   : > { %1768 = vmatprep.mubr.msk.f32.mxu0 %vm1999_vm1, %v1998_v8 }
 0x2b3   : > { %v1070_v30 = vpop.permute.xlu1 %1069 }
 0x2b4   : > { %1767 = vmatpush3.xpose.msk.msra.mxu0 %vm575_vm2, %v1070_v30 }
 0x2b5   : > { %1776 = vmatprep.subr.mxu0 %v1998_v8 }
 0x2b7   : > { %v1068_v31 = vpop.permute.xlu1 %1067 }
 0x2b8   : > { %1769 = vmatmul.mubr.msk.f32.vlgmr.msra.gmra.mxu0 %vm575_vm2, %v1068_v31 }
 0x2b9   : > { %1784 = vmatprep.mubr.msk.f32.mxu0 %vm1999_vm1, %v1998_v8  ;;  %1777 = vmatpush3.msra.mxu0 %v1252_v7 }
 0x2ba   : > { %1778 = vmatprep.subr.mxu0 %v1998_v8 }
 0x2bb   : > { %v660_v32 = vpop.permute.xlu1 %659  ;;  %1779 = vmatpush3.msra.mxu0 %v1251_v9 }
 0x2bc   : > { %1742 = vmatpush3.msra.mxu1 %v660_v32  ;;  %1780 = vmatprep.subr.mxu0 %v1998_v8 }
 0x2bd   : > { %1751 = vmatprep.subr.mxu1 %v1998_v8  ;;  %1781 = vmatpush3.msra.mxu0 %v1250_v12 }
 0x2be   : > { %1782 = vmatprep.subr.mxu0 %v1998_v8 }
 0x2bf   : > { %1783 = vmatpush3.msra.mxu0 %v1249_v18 }
 0x2c0   : > { %1798 = vmatprep.subr.mxu0 %v1998_v8 }
 0x367   : > { %v646_v33 = vpop.f32.mrf.mxu1 }
 0x368   : > { %v650_v34 = vsel %vm575_vm2, %v646_v33, -inf }
 0x369   : > { %651 = vmax.xlane.f32.xlu1 %v650_v34  ;;  %v1740_v35 = vpop.f32.mrf.mxu1 }
 0x36b   : > { %v811_v36 = vpop.f32.mrf.mxu0 }
 0x36c   : > { %v815_v37 = vsel %vm575_vm2, %v811_v36, -inf }
 0x36d   : > { %816 = vmax.xlane.f32.xlu0 %v815_v37  ;;  %v1750_v38 = vpop.f32.mrf.mxu0 }
 0x370   : > { %v976_v39 = vpop.f32.mrf.mxu0 }
 0x371   : > { %v980_v40 = vsel %vm575_vm2, %v976_v39, -inf }
 0x372   : > { %v1760_v41 = vpop.f32.mrf.mxu0  ;;  %981 = vmax.xlane.f32.xlu1 %v980_v40 }
 0x378   : > { %v1141_v42 = vpop.f32.mrf.mxu0 }
 0x379   : > { %v1145_v43 = vsel %vm575_vm2, %v1141_v42, -inf }
 0x37a   : > { %1146 = vmax.xlane.f32.xlu0 %v1145_v43  ;;  %v1770_v44 = vpop.f32.mrf.mxu0 }
 0x383   : > { %989 = vrot.lane.b32.xlu1 %v2233_v23, %s2008_s24  ;;  %s2012_s24 = smov 16  }
 0x387   : > { %1154 = vrot.lane.b32.xlu1 %v2233_v23, %s2009_s25  ;;  %s2013_s25 = smov 24  }
 0x390   : > { %824 = vrot.lane.b32.xlu0 %v2233_v23, %s2010_s27 }
 0x3f2   : > { %v652_v45 = vpop.xlane.xlu1 %651 }
 0x3f3   : > { %v653_v46 = vsub.f32 %v646_v33, %v652_v45 }
 0x3f5   : > { %v654_v47 = vmul.f32 1.442695, %v653_v46 }
 0x3f6   : > { %v817_v48 = vpop.xlane.xlu0 %816 }
 0x3f7   : > { %1881 = vpow2.f32 %v654_v47  ;;  %v818_v49 = vsub.f32 %v811_v36, %v817_v48  ;;  %v1673_v36 = vld [vmem:[%s2425_s6] ss:$0 sm:$0xff]  ;;  %v1366_v47 = vld [vmem:[%s2428_s9 + $0x18] sm:$0xff]  ;;  %v1364_v48 = vld [vmem:[%s2428_s9 + $0x8] sm:$0xff] }
 0x3f9   : > { %v819_v50 = vmul.f32 1.442695, %v818_v49  ;;  %v1363_v49 = vld [vmem:[%s2428_s9] sm:$0xff] }
 0x3fb   : > { %1883 = vpow2.f32 %v819_v50  ;;  %v982_v51 = vpop.xlane.xlu1 %981 }
 0x3fc   : > { %v983_v52 = vsub.f32 %v976_v39, %v982_v51 }
 0x3fe   : > { %v984_v53 = vmul.f32 1.442695, %v983_v52 }
 0x3ff   : > { %v990_v60 = vpop.permute.xlu1 %989 }
 0x400   : > { %1885 = vpow2.f32 %v984_v53 }
 0x403   : > { %v1147_v54 = vpop.xlane.xlu0 %1146  ;;  %v1155_v63 = vpop.permute.xlu1 %1154 }
 0x404   : > { %v1882_v55 = vpop.eup %1881  ;;  %v1148_v56 = vsub.f32 %v1141_v42, %v1147_v54  ;;  %v1675_v54 = vld [vmem:[%s2426_s7] ss:$0 sm:$0xff] }
 0x405   : > { %1744 = vmatmul.mubr.msk.f32.vlgmr.msra.gmra.mxu1 %vm575_vm2, %v1882_v55  ;;  %v656_v4 = vsel %vm575_vm2, %v1882_v55, 0.0 }
 0x406   : > { %v1149_v57 = vmul.f32 1.442695, %v1148_v56  ;;  %1753 = vmatprep.mubr.msk.f32.mxu1 %vm1999_vm1, %v1998_v8  ;;  %v1676_v56 = vld [vmem:[%s2427_s8] ss:$0 sm:$0xff] }
 0x407   : > { %v825_v58 = vpop.permute.xlu0 %824 }
 0x408   : > { %v1884_v59 = vpop.eup %1883  ;;  %1887 = vpow2.f32 %v1149_v57  ;;  %1752 = vmatpush3.msra.mxu1 %v825_v58 }
 0x409   : > { %1754 = vmatmul.mubr.msk.f32.vlgmr.msra.gmra.mxu1 %vm575_vm2, %v1884_v59  ;;  %1761 = vmatprep.subr.mxu1 %v1998_v8  ;;  %v821_v61 = vsel %vm575_vm2, %v1884_v59, 0.0  ;;  %v1481_v59 = vld [vmem:[%s2430_s11 + $0x38] sm:$0xff] }
 0x40a   : > { %822 = vadd.xlane.f32.xlu0 %v821_v61  ;;  %1762 = vmatpush3.msra.mxu1 %v990_v60  ;;  %v1480_v60 = vld [vmem:[%s2430_s11 + $0x30] sm:$0xff]  ;;  %v1479_v61 = vld [vmem:[%s2430_s11 + $0x28] sm:$0xff] }
 0x40b   : > { %1763 = vmatprep.mubr.msk.f32.mxu1 %vm1999_vm1, %v1998_v8  ;;  %1771 = vmatprep.subr.mxu1 %v1998_v8 }
 0x40d   : > { %v1886_v62 = vpop.eup %1885 }
 0x40e   : > { %1764 = vmatmul.mubr.msk.f32.vlgmr.msra.gmra.mxu1 %vm575_vm2, %v1886_v62  ;;  %v986_v1 = vsel %vm575_vm2, %v1886_v62, 0.0  ;;  %v1478_v62 = vld [vmem:[%s2430_s11 + $0x20] sm:$0xff] }
 0x40f   : > { %1772 = vmatpush3.msra.mxu1 %v1155_v63  ;;  %987 = vadd.xlane.f32.xlu1 %v986_v1  ;;  %v1477_v63 = vld [vmem:[%s2430_s11 + $0x18] sm:$0xff]  ;;  %v1476_v1 = vld [vmem:[%s2430_s11 + $0x10] sm:$0xff] }
 0x410   : > { %1773 = vmatprep.mubr.msk.f32.mxu1 %vm1999_vm1, %v1998_v8  ;;  %1787 = vmatprep.subr.mxu1 %v1998_v8 }
 0x415   : > { %v1888_v2 = vpop.eup %1887 }
 0x416   : > { %1774 = vmatmul.mubr.msk.f32.vlgmr.msra.gmra.mxu1 %vm575_vm2, %v1888_v2  ;;  %v1151_v3 = vsel %vm575_vm2, %v1888_v2, 0.0  ;;  %v1475_v2 = vld [vmem:[%s2430_s11 + $0x8] sm:$0xff] }
 0x417   : > { %1152 = vadd.xlane.f32.xlu0 %v1151_v3  ;;  %1795 = vmatprep.mubr.msk.f32.mxu1 %vm1999_vm1, %v1998_v8  ;;  %v1474_v3 = vld [vmem:[%s2430_s11] sm:$0xff] }
 0x418   : > { %1788 = vmatpush3.msra.mxu1 %v1366_v47 }
 0x419   : > { %1789 = vmatprep.subr.mxu1 %v1998_v8 }
 0x41b   : > { %657 = vadd.xlane.f32.xlu0 %v656_v4  ;;  %v1677_v4 = vld [vmem:[%s2429_s10] ss:$0 sm:$0xff] }
 0x493   : > { %v823_v5 = vpop.xlane.xlu0 %822 }
 0x494   : > { %1889 = vrcp.f32 %v823_v5 }
 0x498   : > { %v988_v6 = vpop.xlane.xlu1 %987 }
 0x499   : > { %1891 = vrcp.f32 %v988_v6 }
 0x4a0   : > { %v1153_v11 = vpop.xlane.xlu0 %1152 }
 0x4a1   : > { %v1890_v14 = vpop.eup %1889  ;;  %1893 = vrcp.f32 %v1153_v11 }
 0x4a4   : > { %v658_v27 = vpop.xlane.xlu0 %657 }
 0x4a5   : > { %1895 = vrcp.f32 %v658_v27 }
 0x4a6   : > { %v1892_v19 = vpop.eup %1891 }
 0x4ae   : > { %v1894_v23 = vpop.eup %1893 }
 0x4b2   : > { %v1896_v28 = vpop.eup %1895 }
 0x4c5   : > { %v731_v10 = vpop.f32.mrf.mxu1 }
 0x4c6   : > { %v736_v30 = vmul.f32 %v1896_v28, %v731_v10 }
 0x4c7   : > { %v1745_v13 = vpop.f32.mrf.mxu1 }
 0x4c9   : > { %v896_v15 = vpop.f32.mrf.mxu1 }
 0x4ca   : > { %v901_v16 = vmul.f32 %v1890_v14, %v896_v15 }
 0x4cb   : > { %v1755_v17 = vpop.f32.mrf.mxu1 }
 0x4cc   : > { %1233 = vrot.lane.b32.xlu1 %v901_v16, %s2011_s22 }
 0x4ce   : > { %v1061_v20 = vpop.f32.mrf.mxu1 }
 0x4cf   : > { %v1066_v21 = vmul.f32 %v1892_v19, %v1061_v20 }
 0x4d0   : > { %v1765_v22 = vpop.f32.mrf.mxu1 }
 0x4d1   : > { %1237 = vrot.lane.b32.xlu0 %v1066_v21, %s2012_s24  ;;  %s1682_s24 = sshll.u32 %s2106_s29, 7  ;;  %s2014_s29 = smov [#allocation5]  }
 0x4d2   : > { %s1577_s18 = scalar_lea.hbm %s2455_s19, %s1682_s24 }
 0x4d6   : > { %v1226_v24 = vpop.f32.mrf.mxu1 }
 0x4d7   : > { %v1231_v25 = vmul.f32 %v1894_v23, %v1226_v24 }
 0x4d8   : > { %v1775_v26 = vpop.f32.mrf.mxu1 }
 0x4d9   : > { %1241 = vrot.lane.b32.xlu1 %v1231_v25, %s2013_s25  ;;  %s455_s25 = scalar_lea.vmem [#allocation5], %s1655_s13  ;;  %s1935_s13 = sshll.u32 %s2014_s29, 4  ;;  %s1936_s13 = int_to_ptr.vmem [resolvable:$false] %s1935_s13 }
 0x4da   : > { %s1579_s27 = sshll.u32 %s455_s25, 4  ;;  %s1937_s22 = scalar_lea.vmem %s1936_s13, 256  ;;  %s1580_s27 = int_to_ptr.vmem [resolvable:$true] %s1579_s27 }
 0x4db   : > { %s1931_s16 = scalar_lea.vmem %s1580_s27, 128  ;;  %p1938_p3 = scmp.lt.s32.totalorder %s1580_s27, %s1936_s13 }
 0x4dc   : > { %p1932_p11 = scmp.ne.s32.totalorder %s1580_s27, %s1931_s16  ;;  %p1939_p5 = scmp.lt.s32.totalorder %s1937_s22, %s1931_s16 }
 0x4de   : > { %p1933_p13 = pnand %p1932_p11, %p2456_p12  ;;  %p1940_p8 = por %p1939_p5, %p1938_p3 }
 0x4e0   : > { %p1934_p1 = pneg %p1933_p13 }
 0x4e2   : > { %p1941_p10 = pnand %p1940_p8, %p1934_p1 }
 0x53e   : > { %v1234_v29 = vpop.permute.xlu1 %1233 }
 0x53f   : > { %v1244_v32 = vsel %vm575_vm2, %v736_v30, %v1234_v29 }
 0x543   : > { %v1238_v31 = vpop.permute.xlu0 %1237 }
 0x544   : > { %v1246_v33 = vsel %vm1245_vm3, %v1244_v32, %v1238_v31 }
 0x54b   : > { %v1242_v34 = vpop.permute.xlu1 %1241 }
 0x54c   : > { %v1248_v35 = vsel %vm1247_vm4, %v1246_v33, %v1242_v34  ;;  %v1679_v33 = vld [vmem:[%s2431_s12] ss:$0 sm:$0xff] }
 0x54d   : > { %1785 = vmatmul.mubr.msk.f32.vlgmr.msra.gmra.mxu0 %vm459_vm0, %v1248_v35 }
 0x54e   : > { %1814 = vmatprep.mubr.msk.f32.mxu0 %vm1999_vm1, %v1998_v8  ;;  %1799 = vmatpush3.msra.mxu0 %v1481_v59 }
 0x54f   : > { %1800 = vmatprep.subr.mxu0 %v1998_v8 }
 0x550   : > { %1801 = vmatpush3.msra.mxu0 %v1480_v60 }
 0x551   : > { %1802 = vmatprep.subr.mxu0 %v1998_v8 }
 0x552   : > { %1803 = vmatpush3.msra.mxu0 %v1479_v61 }
 0x553   : > { %1804 = vmatprep.subr.mxu0 %v1998_v8 }
 0x554   : > { %1805 = vmatpush3.msra.mxu0 %v1478_v62 }
 0x555   : > { %1806 = vmatprep.subr.mxu0 %v1998_v8 }
 0x556   : > { %1807 = vmatpush3.msra.mxu0 %v1477_v63 }
 0x557   : > { %1808 = vmatprep.subr.mxu0 %v1998_v8 }
 0x558   : > { %1809 = vmatpush3.msra.mxu0 %v1476_v1 }
 0x559   : > { %1810 = vmatprep.subr.mxu0 %v1998_v8 }
 0x55a   : > { %1811 = vmatpush3.msra.mxu0 %v1475_v2 }
 0x55b   : > { %1812 = vmatprep.subr.mxu0 %v1998_v8 }
 0x55c   : > { %1813 = vmatpush3.msra.mxu0 %v1474_v3 }
 0x60d   : > { %v1329_v37 = vpop.f32.mrf.mxu0 }
 0x60e   : > { %v1330_v38 = vadd.f32 %v1673_v36, %v1329_v37 }
 0x60f   : > { %v1786_v39 = vpop.f32.mrf.mxu0 }
 0x610   : > { %v2315_v40 = vadd.f32 %v1330_v38, %v2193_v0  ;;  %v1365_v0 = vld [vmem:[%s2428_s9 + $0x10] sm:$0xff] }
 0x611   : > { %1790 = vmatpush3.msra.mxu1 %v1365_v0 }
 0x612   : > { %v1336_v41 = vsel %vm459_vm0, %v2315_v40, 0.0  ;;  %1791 = vmatprep.subr.mxu1 %v1998_v8 }
 0x613   : > { %1337 = vadd.xlane.f32.xlu1 %v1336_v41  ;;  %1792 = vmatpush3.msra.mxu1 %v1364_v48 }
 0x614   : > { %1793 = vmatprep.subr.mxu1 %v1998_v8 }
 0x615   : > { %1794 = vmatpush3.msra.mxu1 %v1363_v49 }
 0x69c   : > { %v1338_v42 = vpop.xlane.xlu1 %1337 }
 0x69d   : > { %v1339_v43 = vmul.f32 0.03125, %v1338_v42 }
 0x69f   : > { %v1340_v44 = vsub.f32 %v2315_v40, %v1339_v43 }
 0x6a1   : > { %v1341_v45 = vmul.f32 %v1340_v44, %v1340_v44 }
 0x6a3   : > { %v1342_v46 = vsel %vm459_vm0, %v1341_v45, 0.0 }
 0x6a4   : > { %1343 = vadd.xlane.f32.xlu0 %v1342_v46 }
 0x72d   : > { %v1344_v50 = vpop.xlane.xlu0 %1343 }
 0x72e   : > { %v1345_v51 = vmul.f32 0.03125, %v1344_v50 }
 0x730   : > { %v1346_v52 = vadd.f32 1e-05, %v1345_v51 }
 0x732   : > { %1897 = vrsqrt.f32 %v1346_v52 }
 0x73f   : > { %v1898_v53 = vpop.eup %1897 }
 0x740   : > { %v1348_v55 = vmul.f32 %v1898_v53, %v1340_v44 }
 0x742   : > { %v1355_v57 = vmul.f32 %v1675_v54, %v1348_v55 }
 0x744   : > { %v1362_v58 = vadd.f32 %v1676_v56, %v1355_v57 }
 0x746   : > { %1796 = vmatmul.mubr.msk.f32.vlgmr.msra.gmra.mxu1 %vm459_vm0, %v1362_v58 }
 0x806   : > { %v1443_v5 = vpop.f32.mrf.mxu1 }
 0x807   : > { %v1444_v6 = vadd.f32 %v1677_v4, %v1443_v5 }
 0x808   : > { %v1797_v7 = vpop.f32.mrf.mxu1 }
 0x809   : > { %v1448_v9 = vmul.f32 0.70710677, %v1444_v6  ;;  %v1447_v30 = vmul.f32 0.5, %v1444_v6 }
 0x80b   : > { %v1449_v10 = vand.u32 2147483647, %v1448_v9  ;;  %vm1469_vm5 = vcmp.lt.f32.partialorder %v1448_v9, 0.0 }
 0x80d   : > { %v1450_v11 = vmul.f32 0.3275911, %v1449_v10  ;;  %v1463_v13 = vsub.f32 0.0, %v1449_v10 }
 0x80f   : > { %v1451_v12 = vadd.f32 1.0, %v1450_v11  ;;  %v1464_v14 = vmul.f32 %v1463_v13, %v1449_v10 }
 0x811   : > { %1899 = vrcp.f32 %v1451_v12  ;;  %v1465_v17 = vmul.f32 1.442695, %v1464_v14 }
 0x813   : > { %1901 = vpow2.f32 %v1465_v17 }
 0x81e   : > { %v1900_v15 = vpop.eup %1899 }
 0x81f   : > { %v1454_v16 = vmul.f32 1.0614054, %v1900_v15 }
 0x820   : > { %v1902_v25 = vpop.eup %1901 }
 0x821   : > { %v1455_v18 = vadd.f32 -1.4531521, %v1454_v16 }
 0x823   : > { %v1456_v8 = vmul.f32 %v1900_v15, %v1455_v18 }
 0x825   : > { %v1457_v19 = vadd.f32 1.4214138, %v1456_v8 }
 0x827   : > { %v1458_v20 = vmul.f32 %v1900_v15, %v1457_v19 }
 0x829   : > { %v1459_v21 = vadd.f32 -0.28449672, %v1458_v20 }
 0x82b   : > { %v1460_v22 = vmul.f32 %v1900_v15, %v1459_v21 }
 0x82d   : > { %v1461_v23 = vadd.f32 0.2548296, %v1460_v22 }
 0x82f   : > { %v1462_v24 = vmul.f32 %v1900_v15, %v1461_v23 }
 0x831   : > { %v1467_v26 = vmul.f32 %v1902_v25, %v1462_v24 }
 0x833   : > { %v1468_v27 = vsub.f32 1.0, %v1467_v26 }
 0x835   : > { %v1470_v28 = vsub.f32 0.0, %v1468_v27 }
 0x837   : > { %v1471_v29 = vsel %vm1469_vm5, %v1470_v28, %v1468_v27 }
 0x838   : > { %v1472_v31 = vadd.f32 1.0, %v1471_v29 }
 0x83a   : > { %v1473_v32 = vmul.f32 %v1472_v31, %v1447_v30 }
 0x83c   : > { %1815 = vmatmul.mubr.msk.f32.vlgmr.msra.gmra.mxu0 %vm1489_vm6, %v1473_v32 }
 0x8fc   : > { %v1559_v34 = vpop.f32.mrf.mxu0 }
 0x8fd   : > { %v1560_v35 = vadd.f32 %v1679_v33, %v1559_v34 }
 0x8fe   : > { %v1816_v36 = vpop.f32.mrf.mxu0 }
 0x8ff   : > { %v1563_v37 = vadd.f32 %v1560_v35, %v2315_v40 }
 0x901   : > { %1564 = vst.msk [vmem:[%s455_s25] sm:$0xff] %vm459_vm0, %v1563_v37 }
 0x902   : > { %1944 = shalt.err (!%p1941_p10)
}
 0x903   : > { %s1945_s30 = scalar_lea.hbm %s1577_s18, 128  ;;  %s1949_s24 = scalar_lea.hbm %s2455_s19, 256 }
 0x904   : > { %p1946_p2 = scmp.ne.s32.totalorder %s1577_s18, %s1945_s30  ;;  %p1950_p7 = scmp.lt.s32.totalorder %s1577_s18, %s2455_s19 }
 0x905   : > { %p1951_p0 = scmp.lt.s32.totalorder %s1949_s24, %s1945_s30 }
 0x906   : > { %p1947_p4 = pnand %p1946_p2, %p2456_p12 }
 0x907   : > { %p1952_p6 = por %p1951_p0, %p1950_p7 }
 0x908   : > { %p1948_p9 = pneg %p1947_p4 }
 0x90a   : > { %p1953_p11 = pnand %p1952_p6, %p1948_p9 }
 0x90c   : > { %1956 = shalt.err (!%p1953_p11)
}
 0x90d   : > { %1819 = dma.vmem_to_hbm [thread:$0]  (%p2456_p12), %s1580_s27, 128, %s1577_s18, %s1566_s15  }
 0x90e PF: > { %s2457_s17 = sld [smem:[#allocation8_spill]]  ;;  %p2460_p1 = scmp.ge.s32.totalorder %s1995_s28, 2 }
 0x90f   : > { %s2458_s16 = sld [smem:[#allocation12_spill]] }
 0x914   : > { %s1591_s29 = sand.u32 1, %s2457_s17  }
 0x915   : > { %p2459_p13 = scmp.ne.s32.totalorder %s2458_s16, 0  ;;  %s1592_s13 = scalar_lea.sflag [#allocation4], %s1591_s29 }
 0x917   : > { %p1826_p3 = pnand %p2460_p1, %p2459_p13 }
 0x919   : > { %p1827_p5 = pneg %p1826_p3 }
 0x91b   : > { %1978 = dma.done.wait (%p1827_p5), %s1592_s13, 128  }
 0x91c   : > { %1980 = vsyncadd (%p1827_p5), %s1592_s13, 4294967168  ;;  %s2461_s28 = sld [smem:[#allocation10_spill]]  ;;  %s2464_s25 = smov %s1987_s26 }
 0x91d   : > { %s2462_s22 = sld [smem:[#allocation9_spill]] }
 0x91e   : > { %s2463_s27 = sld [smem:[#allocation11_spill]] }
 0x922   : > { %p26_p8 = scmp.ge.s32.totalorder %s2461_s28, 4  }
 0x923   : > { %s2465_s26 = smov %s2462_s22 }
 0x924   :  { %28 = sbr.rel (!%p26_p8) target bundleno = 7 (0x7), region = 117 }
 0x929   :  { %1597 = vsyncpa [#allocation3], 1 }
 0x92a   :  { %1599 = vsyncpa [#allocation3 + $0x1], 1 }
 0x92b   :  { %1600 = vsyncpa [#allocation4], 1 }
 0x92c   :  { %1602 = vsyncpa [#allocation4 + $0x1], 1 }

</bundles_post_ra>
